<compile_context>
chip_gen: v7x
topology: tpu7x:2x2x1
jax: 0.10.0
libtpu: 0.0.40
codegen_flags: <defaults>
</compile_context>

<pallas_src>
import math

import jax
import jax.numpy as jnp
from jax.experimental import pallas as pl
from jax.experimental.pallas import tpu as pltpu


def _build_pe_table(d_model: int, max_len: int) -> jnp.ndarray:
    """Deterministic sin/cos positional-encoding buffer matching the torch init."""
    assert d_model % 2 == 0, "PositionalEncoding requires an even d_model (same as the torch snippet)"
    position = jnp.arange(0, max_len, dtype=jnp.float32)[:, None]           # (max_len, 1)
    div_term = jnp.exp(
        jnp.arange(0, d_model, 2, dtype=jnp.float32) * (-math.log(10000.0) / d_model)
    )                                                                        # (d_model//2,)
    angles = position * div_term                                             # (max_len, d_model//2)
    pe = jnp.zeros((max_len, d_model), dtype=jnp.float32)
    pe = pe.at[:, 0::2].set(jnp.sin(angles))
    pe = pe.at[:, 1::2].set(jnp.cos(angles))
    return pe                                                                # (max_len, d_model)


def _round_up(v: int, m: int) -> int:
    return ((v + m - 1) // m) * m


def positional_encoding_forward(
    x: jnp.ndarray,
    pe_table: jnp.ndarray,
    *,
    scale: float | None = None,                 # optional fused embedding scale (x*scale + pe)
    block_budget_bytes: int = 4 * 1024 * 1024,  # target bytes per x block (~sweet spot on v6e/v7x)
    single_block_max_bytes: int = 2 * 1024 * 1024,  # below this, one block / no megacore split
) -> jnp.ndarray:
    """x: (B, S, D); pe_table: (max_len, D). Returns x(+scale) + pe[:S] (broadcast over batch)."""
    B, S, D = x.shape
    max_len, d_model = pe_table.shape
    if S > max_len:
        raise ValueError(f"sequence length {S} exceeds positional-encoding max_len {max_len}")
    if D != d_model:
        raise ValueError(f"d_model mismatch: x has {D}, pe table has {d_model}")

    pe = pe_table[:S, :].astype(x.dtype)

    # Lane-dense flattening: (B, S, D) -> (B, N) with N = S*D as the lane axis.
    N = S * D
    x2 = x.reshape(B, N)
    pe2 = pe.reshape(1, N)

    itemsize = x.dtype.itemsize
    sub_mult = {1: 32, 2: 16}.get(itemsize, 8)   # dtype-aware sublane packing granularity
    total_bytes = B * N * itemsize

    if total_bytes <= single_block_max_bytes:
        # Tiny input: single full-array block; per-step overhead paid once,
        # megacore sharding irrelevant at this size.
        tb, tn = B, N
    else:
        row_bytes = N * itemsize
        if row_bytes * sub_mult <= block_budget_bytes:
            # Preferred: full lane extent (one contiguous DMA per block, pe resident);
            # shrink the batch tile to fit the per-block budget.
            tn = N
            rows = max(sub_mult, (block_budget_bytes // row_bytes) // sub_mult * sub_mult)
            tb = min(B, rows)
        else:
            # N alone exceeds the budget: tile the lane axis too (multiple of 128).
            tb = min(B, sub_mult)
            tn = min(N, max(128, (block_budget_bytes // (tb * itemsize)) // 128 * 128))

        # Guarantee grid extent >= 2 for large inputs so v7x's two TensorCores
        # both get work (otherwise half the chip's HBM bandwidth idles).
        if tb >= B and tn >= N:
            if B > sub_mult:
                tb = min(B, _round_up(-(-B // 2), sub_mult))   # ceil(B/2) rounded to sub_mult
            elif N > 256:
                tn = _round_up(-(-N // 2), 128)                # split the lane axis instead

    # N-tiles outer, B-tiles inner: pe block index constant over the inner loop.
    grid = (pl.cdiv(N, tn), pl.cdiv(B, tb))

    # Size the scoped-VMEM limit from the actual double-buffered working set
    # (2x x-in + 2x out + 2x pe row), clamped so it is always >= the scoped
    # defaults we may exceed (v5e 16 MiB) and <= v7x-safe 48 MiB.
    block_bytes = tb * tn * itemsize
    working_set = 4 * block_bytes + 2 * tn * itemsize
    vmem_limit = max(32 << 20, min(48 << 20, (working_set * 3) // 2))

    if scale is None:
        def kernel(x_ref, pe_ref, o_ref):
            # x_ref/o_ref: (tb, tn); pe_ref: (1, tn) -> implicit sublane broadcast.
            o_ref[...] = x_ref[...] + pe_ref[...]
    else:
        s = float(scale)
        def kernel(x_ref, pe_ref, o_ref):
            # Fused embedding scale: one extra VPU mul per vreg, free under DMA bound.
            o_ref[...] = x_ref[...] * s + pe_ref[...]

    # TODO(synk): if the surrounding model applies dropout after the add (common
    # in NMT transformers but absent from this module's forward), fuse it here via
    # pltpu.prng_seed/prng_random_bits instead of a separate elementwise pass.

    out2 = pl.pallas_call(
        kernel,
        out_shape=jax.ShapeDtypeStruct((B, N), x.dtype),
        grid_spec=pltpu.PrefetchScalarGridSpec(
            num_scalar_prefetch=0,
            grid=grid,
            in_specs=[
                pl.BlockSpec((tb, tn), lambda nj, bi: (bi, nj)),  # x tile
                pl.BlockSpec((1, tn), lambda nj, bi: (0, nj)),    # pe row, reused across batch
            ],
            out_specs=pl.BlockSpec((tb, tn), lambda nj, bi: (bi, nj)),
        ),
        input_output_aliases={0: 0},   # in-place add on the (B, N) buffer when x is donated
        compiler_params=pltpu.CompilerParams(
            dimension_semantics=("parallel", "parallel"),
            vmem_limit_bytes=int(vmem_limit),
        ),
    )(x2, pe2)

    return out2.reshape(B, S, D)


if __name__ == "__main__":
    key = jax.random.PRNGKey(0)

    # --- Case 1: tiny demo shapes (collapses to a single full-array block) ---
    batch, seq, d_model, max_len = 2, 8, 32, 64
    x = jax.random.normal(key, (batch, seq, d_model), dtype=jnp.float32)
    pe_table = _build_pe_table(d_model, max_len)
    ref = x + pe_table[None, :seq, :]

    out = jax.block_until_ready(positional_encoding_forward(x, pe_table))
    assert out.shape == x.shape
    assert jnp.allclose(out, ref, atol=1e-6), "case 1: mismatch vs reference"

    # --- Case 2: tiny budgets to exercise the lane-split path + partial blocks
    #     on both axes (grid (2, 2)) at small shapes ---
    batch2, seq2, d_model2, max_len2 = 10, 40, 64, 64
    key2 = jax.random.fold_in(key, 1)
    x2 = jax.random.normal(key2, (batch2, seq2, d_model2), dtype=jnp.float32)
    pe_table2 = _build_pe_table(d_model2, max_len2)
    ref2 = x2 + pe_table2[None, :seq2, :]

    out2 = jax.block_until_ready(
        positional_encoding_forward(
            x2, pe_table2,
            block_budget_bytes=64 * 1024,
            single_block_max_bytes=32 * 1024,
        )
    )
    assert out2.shape == x2.shape
    assert jnp.allclose(out2, ref2, atol=1e-6), "case 2: mismatch vs reference"

    # --- Case 3: exercise the forced >=2-grid-point (megacore) split and the
    #     fused embedding-scale path ---
    batch3, seq3, d_model3, max_len3 = 16, 64, 32, 128
    key3 = jax.random.fold_in(key, 2)
    x3 = jax.random.normal(key3, (batch3, seq3, d_model3), dtype=jnp.float32)
    pe_table3 = _build_pe_table(d_model3, max_len3)
    sc = math.sqrt(d_model3)
    ref3 = x3 * sc + pe_table3[None, :seq3, :]

    out3 = jax.block_until_ready(
        positional_encoding_forward(
            x3, pe_table3,
            scale=sc,
            block_budget_bytes=1 << 20,
            single_block_max_bytes=64 * 1024,
        )
    )
    assert out3.shape == x3.shape
    assert jnp.allclose(out3, ref3, atol=1e-5), "case 3: mismatch vs reference"

    print("KERNEL_OK")
</pallas_src>

<mosaic_0001>
module attributes {stable_mosaic.version = 11 : i64} {
  func.func @kernel(%arg0: i32, %arg1: i32, %arg2: memref<2x256xf32, #tpu.memory_space<vmem>>, %arg3: memref<1x256xf32, #tpu.memory_space<vmem>>, %arg4: memref<2x256xf32, #tpu.memory_space<vmem>>) attributes {dimension_semantics = [#tpu.dimension_semantics<parallel>, #tpu.dimension_semantics<parallel>], iteration_bounds = array<i64: 1, 1>, scalar_prefetch = 0 : i64, scratch_operands = 0 : i64, tpu.core_type = #tpu.core_type<tc>, window_params = [{transform_indices = @transform_0, window_bounds = array<i64: 2, 256>}, {transform_indices = @transform_1, window_bounds = array<i64: 1, 256>}, {transform_indices = @transform_2, window_bounds = array<i64: 2, 256>}]} {
    %c0 = arith.constant 0 : index
    %c0_0 = arith.constant 0 : index
    %0 = vector.load %arg2[%c0, %c0_0] : memref<2x256xf32, #tpu.memory_space<vmem>>, vector<2x256xf32>
    %c0_1 = arith.constant 0 : index
    %c0_2 = arith.constant 0 : index
    %1 = vector.load %arg3[%c0_1, %c0_2] : memref<1x256xf32, #tpu.memory_space<vmem>>, vector<1x256xf32>
    %2 = vector.broadcast %1 : vector<1x256xf32> to vector<2x256xf32>
    %3 = arith.addf %0, %2 : vector<2x256xf32>
    %c0_3 = arith.constant 0 : index
    %c0_4 = arith.constant 0 : index
    %4 = vector.load %arg4[%c0_3, %c0_4] : memref<2x256xf32, #tpu.memory_space<vmem>>, vector<2x256xf32>
    tpu.vector_store %arg4[%c0_3, %c0_4], %3 {strides = array<i32>} : memref<2x256xf32, #tpu.memory_space<vmem>>, vector<2x256xf32>,
    return
  }
  func.func @transform_0(%arg0: i32, %arg1: i32) -> (i32, i32) {
    %c0_i32 = arith.constant 0 : i32
    return %arg1, %arg0 : i32, i32
  }
  func.func @transform_1(%arg0: i32, %arg1: i32) -> (i32, i32) {
    %c0_i32 = arith.constant 0 : i32
    %c0_i32_0 = arith.constant 0 : i32
    return %c0_i32, %arg0 : i32, i32
  }
  func.func @transform_2(%arg0: i32, %arg1: i32) -> (i32, i32) {
    %c0_i32 = arith.constant 0 : i32
    return %arg1, %arg0 : i32, i32
  }
}

</mosaic_0001>

<bundles_post_ra>
// kernel: tpu_custom_call.1
= control target key start
LH: loop header
LB: loop body
LE: loop exit
PB: predicated region body
PF: predicated region fallthrough
CT: control target
= control target key end

     0   :  { %7 = vsyncpa [#allocation3], 0  ;;  %s157_s0 = inlined_call_operand.hbm [shape: f32[2,256], index: 0, kind: input, shape index: {}, may-alias: {0,2}]   ;;  %s158_s1 = inlined_call_operand.vmem [shape: f32[1,256], index: 1, kind: input, shape index: {}]   ;;  %s159_s2 = inlined_call_operand.hbm [shape: f32[2,256], index: 2, kind: output, shape index: {}, may-alias: {0,2}]  }
   0x1   :  { %8 = vsyncpa [#allocation4], 0  ;;  %s112_s9 = smov [#allocation2]   ;;  %s64_s13 = scalar_lea.hbm %s157_s0, 64 }
   0x2   :  { %s15_s10 = sshll.u32 %s112_s9, 4  ;;  %p65_p0 = scmp.ne.s32.totalorder %s157_s0, %s64_s13  ;;  %s16_s10 = int_to_ptr.vmem [resolvable:$true] %s15_s10 }
   0x3   :  { %p68_p1 = scmp.lt.u32.totalorder %s64_s13, %s157_s0 }
   0x5   :  { %p70_p2 = pnand %p68_p1, %p65_p0 }
   0x7   :  { %73 = shalt.err (!%p70_p2)
}
   0x8   :  { %s74_s18 = scalar_lea.vmem %s16_s10, 64  ;;  %p79_p4 = scmp.lt.s32.totalorder %s16_s10, %s16_s10 }
   0x9   :  { %p75_p3 = scmp.ne.s32.totalorder %s16_s10, %s74_s18  ;;  %p80_p5 = scmp.lt.s32.totalorder %s74_s18, %s74_s18 }
   0xb   :  { %p81_p6 = por %p80_p5, %p79_p4 }
   0xd   :  { %p82_p7 = pnand %p81_p6, %p75_p3 }
   0xf   :  { %85 = shalt.err (!%p82_p7)
}
  0x10   :  { %18 = dma.hbm_to_vmem [thread:$0]  %s157_s0, 64, %s16_s10, [#allocation3]  }
  0x11   :  { %108 = dma.done.wait [#allocation3], 64  }
  0x12   :  { %109 = vsyncadd [#allocation3], 4294967232  ;;  %v27_v0 = vlaneseq  ;;  %v113_v1 = vmov 1983009808   ;;  %v25_v7 = vld [vmem:[%s158_s1] sm:$0x3] }
  0x13   :  { %v37_v2 = vunpack.c.l.s4 %v113_v1  ;;  %v24_v12 = vld [vmem:[#allocation2] sm:$0xf]  ;;  %s114_s23 = smov [#allocation5]  }
  0x14   :  { %v28_v3 = vshrl.u32 %v27_v0, 7  ;;  %s52_s0 = sshll.u32 %s114_s23, 4  ;;  %s53_s0 = int_to_ptr.vmem [resolvable:$true] %s52_s0 }
  0x15   :  { %v38_v6 = vunpack.c.0.s8 %v37_v2  ;;  %s86_s24 = scalar_lea.vmem %s53_s0, 64  ;;  %p91_p9 = scmp.lt.s32.totalorder %s53_s0, %s53_s0 }
  0x16   :  { %v29_v4 = vsub.s32 0, %v28_v3  ;;  %v33_v5 = vsub.s32 1, %v28_v3  ;;  %p87_p8 = scmp.ne.s32.totalorder %s53_s0, %s86_s24  ;;  %p92_p10 = scmp.lt.s32.totalorder %s86_s24, %s86_s24 }
  0x17   :  { %v41_v10 = vsub.s32 %v38_v6, %v28_v3 }
  0x18   :  { %v30_v8 = vrot.slane %v25_v7, %v29_v4  ;;  %v34_v9 = vrot.slane %v25_v7, %v33_v5  ;;  %p93_p11 = por %p92_p10, %p91_p9 }
  0x1a   :  { %v35_v11 = vcombine.low %v30_v8, %v34_v9  ;;  %p94_p12 = pnand %p93_p11, %p87_p8 }
  0x1c   :  { %v42_v13 = vrot.slane %v35_v11, %v41_v10 }
  0x1e   :  { %v44_v14 = vadd.f32 %v42_v13, %v24_v12 }
  0x20   :  { %45 = vst [vmem:[#allocation5] sm:$0xf] %v44_v14 }
  0x21   :  { %97 = shalt.err (!%p94_p12)
}
  0x22   :  { %s98_s26 = scalar_lea.hbm %s159_s2, 64 }
  0x23   :  { %p99_p13 = scmp.ne.s32.totalorder %s159_s2, %s98_s26  ;;  %p102_p0 = scmp.lt.u32.totalorder %s98_s26, %s159_s2 }
  0x25   :  { %p104_p1 = pnand %p102_p0, %p99_p13 }
  0x27   :  { %107 = shalt.err (!%p104_p1)
}
  0x28   :  { %55 = dma.vmem_to_hbm [thread:$0]  %s53_s0, 64, %s159_s2, [#allocation4]  }
  0x29   :  { %110 = dma.done.wait [#allocation4], 64  }
  0x2a   :  { %111 = vsyncadd [#allocation4], 4294967232 }
  0x2b   :  { %59 = vsyncpa [#allocation3], 1 }
  0x2c   :  { %60 = vsyncpa [#allocation4], 1 }

</bundles_post_ra>
